<compile_context>
chip_gen: v7x
topology: tpu7x:2x2x1
jax: 0.10.0
libtpu: 0.0.40
codegen_flags: <defaults>
</compile_context>

<pallas_src>
import math
import functools

import jax
import jax.numpy as jnp
from jax.experimental import pallas as pl
from jax.experimental.pallas import tpu as pltpu


def _erf_poly(x):
    """Abramowitz & Stegun 7.1.26 erf approximation (f32, max abs err ~1.5e-7)."""
    a1, a2, a3, a4, a5 = 0.254829592, -0.284496736, 1.421413741, -1.453152027, 1.061405429
    p = 0.3275911
    ax = jnp.abs(x)
    t = 1.0 / (1.0 + p * ax)
    poly = ((((a5 * t + a4) * t + a3) * t + a2) * t + a1) * t
    e = 1.0 - poly * jnp.exp(-ax * ax)
    return jnp.where(x >= 0, e, -e)


def _gelu_exact(x):
    """Exact (erf-based) GELU, matching torch nn.GELU() default."""
    return 0.5 * x * (1.0 + _erf_poly(x * (1.0 / math.sqrt(2.0))))


def _attn_block_kernel(xres_ref, q_ref, k_ref, v_ref,
                       wfc_ref, bfc_ref, gamma_ref, beta_ref,
                       o_ref, m_sc, l_sc, acc_sc,
                       *, compute_dtype, exp_dtype):
    ki = pl.program_id(2)
    num_kv = pl.num_programs(2)
    num_heads, tq, depth = q_ref.shape
    d_model = num_heads * depth

    @pl.when(ki == 0)
    def _init():
        m_sc[...] = jnp.full(m_sc.shape, -jnp.inf, dtype=jnp.float32)
        l_sc[...] = jnp.zeros(l_sc.shape, dtype=jnp.float32)
        acc_sc[...] = jnp.zeros(acc_sc.shape, dtype=jnp.float32)

    # Scores for all heads at once: (H, tq, tk).  Q already carries 1/sqrt(depth).
    s = jnp.einsum("hqd,hkd->hqk", q_ref[...], k_ref[...],
                   preferred_element_type=jnp.float32)

    # Online softmax update (f32 running statistics).
    m_prev = m_sc[...]
    m_new = jnp.maximum(m_prev, jnp.max(s, axis=-1, keepdims=True))
    alpha = jnp.exp(m_prev - m_new)
    p = jnp.exp((s - m_new).astype(exp_dtype))          # bf16 exp ~2x EUP rate on v6e/v7x
    l_sc[...] = alpha * l_sc[...] + jnp.sum(p.astype(jnp.float32), axis=-1, keepdims=True)
    acc_sc[...] = alpha * acc_sc[...] + jnp.einsum(
        "hqk,hkd->hqd", p.astype(compute_dtype), v_ref[...],
        preferred_element_type=jnp.float32)
    m_sc[...] = m_new

    @pl.when(ki == num_kv - 1)
    def _finalize():
        inv_l = pl.reciprocal(l_sc[...], approx=True)                   # EUP slot
        o = acc_sc[...] * inv_l                                         # (H, tq, depth) f32
        # Merge heads once per q-tile (amortized over all kv steps).
        o = jnp.transpose(o, (1, 0, 2)).reshape(tq, d_model)            # (tq, D)
        y = jnp.dot(o.astype(compute_dtype), wfc_ref[...],
                    preferred_element_type=jnp.float32) + bfc_ref[...]
        resid = xres_ref[...].astype(jnp.float32)
        z = _gelu_exact(y) + resid
        # LayerNorm over last dim (eps = 1e-5, nn.LayerNorm default).
        mu = jnp.mean(z, axis=-1, keepdims=True)
        var = jnp.mean((z - mu) * (z - mu), axis=-1, keepdims=True)
        zn = (z - mu) * jax.lax.rsqrt(var + 1e-5)
        o_ref[...] = (zn * gamma_ref[...] + beta_ref[...]).astype(o_ref.dtype)


def attention_block(x, params, num_heads, *, q_tile=None, kv_tile=None,
                    compute_dtype=jnp.bfloat16, exp_dtype=None,
                    vmem_limit_bytes=48 * 1024 * 1024):
    """x: (B, S, D). params: dict of pre-transposed (in, out) weights / (1, D) biases.

    exp_dtype: dtype for the softmax exponentials (default f32; pass jnp.bfloat16 on
    v6e/v7x to relieve the EUP slot — keep f32 on v5e).
    """
    B, S, D = x.shape
    assert D % num_heads == 0, "d_model must be divisible by num_heads"
    depth = D // num_heads

    if q_tile is None:
        q_tile = min(S, 128)     # on v6e/v7x with large S, 256 feeds the 256-wide MXU better
    if kv_tile is None:
        kv_tile = min(S, 128)
    assert S % q_tile == 0 and S % kv_tile == 0
    if exp_dtype is None:
        exp_dtype = jnp.float32

    # ---- Hoisted Q/K/V projections (one XLA matmul each), head-major layout --------
    x2d = x.reshape(B * S, D).astype(compute_dtype)

    def project(w, b, scale=1.0):
        y = jnp.dot(x2d, w.astype(compute_dtype),
                    preferred_element_type=jnp.float32) + b
        y = (y * scale).reshape(B, S, num_heads, depth).transpose(0, 2, 1, 3)
        return y.astype(compute_dtype)                                  # (B, H, S, depth)

    q_hm = project(params["wq"], params["bq"], 1.0 / math.sqrt(depth))
    k_hm = project(params["wk"], params["bk"])
    v_hm = project(params["wv"], params["bv"])
    wfc = params["wfc"].astype(compute_dtype)

    kernel = functools.partial(_attn_block_kernel, compute_dtype=compute_dtype,
                               exp_dtype=exp_dtype)

    const = lambda b, qi, ki: (0, 0)
    single = pl.Buffered(1)      # constant-index weights: no need to double-buffer
    grid = (B, S // q_tile, S // kv_tile)

    return pl.pallas_call(
        kernel,
        out_shape=jax.ShapeDtypeStruct((B, S, D), x.dtype),
        grid_spec=pltpu.PrefetchScalarGridSpec(
            num_scalar_prefetch=0,
            grid=grid,
            in_specs=[
                # x tile for the residual path (copied once per (b, qi)).
                pl.BlockSpec((pl.Squeezed(), q_tile, D), lambda b, qi, ki: (b, qi, 0)),
                # Pre-projected head-major Q / K / V.
                pl.BlockSpec((pl.Squeezed(), num_heads, q_tile, depth),
                             lambda b, qi, ki: (b, 0, qi, 0)),
                pl.BlockSpec((pl.Squeezed(), num_heads, kv_tile, depth),
                             lambda b, qi, ki: (b, 0, ki, 0)),
                pl.BlockSpec((pl.Squeezed(), num_heads, kv_tile, depth),
                             lambda b, qi, ki: (b, 0, ki, 0)),
                # Resident epilogue parameters (single-buffered).
                pl.BlockSpec((D, D), const, pipeline_mode=single),      # Wfc
                pl.BlockSpec((1, D), const, pipeline_mode=single),      # bfc
                pl.BlockSpec((1, D), const, pipeline_mode=single),      # gamma
                pl.BlockSpec((1, D), const, pipeline_mode=single),      # beta
            ],
            out_specs=pl.BlockSpec((pl.Squeezed(), q_tile, D),
                                   lambda b, qi, ki: (b, qi, 0)),
            scratch_shapes=[
                pltpu.VMEM((num_heads, q_tile, 1), jnp.float32),        # running max
                pltpu.VMEM((num_heads, q_tile, 1), jnp.float32),        # running denom
                pltpu.VMEM((num_heads, q_tile, depth), jnp.float32),    # output accumulator
            ],
        ),
        compiler_params=pltpu.CompilerParams(
            dimension_semantics=("parallel", "parallel", "arbitrary"),
            vmem_limit_bytes=vmem_limit_bytes,
        ),
    )(x, q_hm, k_hm, v_hm, wfc, params["bfc"], params["gamma"], params["beta"])


def _reference(x, params, num_heads):
    """Pure-JAX reference mirroring the PyTorch forward (for verification)."""
    B, S, D = x.shape
    depth = D // num_heads
    q = x @ params["wq"] + params["bq"]
    k = x @ params["wk"] + params["bk"]
    v = x @ params["wv"] + params["bv"]

    def split(t):
        return t.reshape(B, S, num_heads, depth).transpose(0, 2, 1, 3)  # (B, H, S, depth)

    Q, K, V = split(q), split(k), split(v)
    scores = jnp.einsum("bhqd,bhkd->bhqk", Q, K) / math.sqrt(depth)
    attn = jax.nn.softmax(scores, axis=-1)
    out = jnp.einsum("bhqk,bhkd->bhqd", attn, V)
    out = out.transpose(0, 2, 1, 3).reshape(B, S, D)
    out = out @ params["wfc"] + params["bfc"]
    z = jax.nn.gelu(out, approximate=False) + x
    mu = jnp.mean(z, axis=-1, keepdims=True)
    var = jnp.mean((z - mu) ** 2, axis=-1, keepdims=True)
    zn = (z - mu) / jnp.sqrt(var + 1e-5)
    return zn * params["gamma"] + params["beta"]


def make_params(key, d_model):
    """Deterministic synthetic parameters. Linear weights stored pre-transposed (in, out)."""
    ks = jax.random.split(key, 8)
    s = 0.08
    return {
        "wq": jax.random.normal(ks[0], (d_model, d_model), jnp.float32) * s,
        "bq": jax.random.normal(ks[1], (1, d_model), jnp.float32) * s,
        "wk": jax.random.normal(ks[2], (d_model, d_model), jnp.float32) * s,
        "bk": jax.random.normal(ks[3], (1, d_model), jnp.float32) * s,
        "wv": jax.random.normal(ks[4], (d_model, d_model), jnp.float32) * s,
        "bv": jax.random.normal(ks[5], (1, d_model), jnp.float32) * s,
        "wfc": jax.random.normal(ks[6], (d_model, d_model), jnp.float32) * s,
        "bfc": jax.random.normal(ks[7], (1, d_model), jnp.float32) * s,
        "gamma": jnp.ones((1, d_model), jnp.float32),   # nn.LayerNorm default init
        "beta": jnp.zeros((1, d_model), jnp.float32),
    }


if __name__ == "__main__":
    B, S, D, H = 2, 16, 32, 4   # small shapes; S=16 with 8-wide tiles exercises the full grid
    key = jax.random.PRNGKey(0)
    kx, kp = jax.random.split(key)
    x = jax.random.normal(kx, (B, S, D), jnp.float32)
    params = make_params(kp, D)

    ref = _reference(x, params, num_heads=H)

    # f32 compute path — checks module semantics (tolerance allows approx-reciprocal /
    # accumulation-order / erf-polynomial differences).
    out_f32 = jax.block_until_ready(
        attention_block(x, params, num_heads=H, q_tile=8, kv_tile=8,
                        compute_dtype=jnp.float32))
    assert out_f32.shape == (B, S, D)
    assert jnp.allclose(out_f32, ref, atol=1e-2, rtol=1e-2), "f32 path mismatch vs reference"

    # bf16 MXU fast path (recommended on v5e/v6e/v7x) — looser tolerance.
    out_bf16 = jax.block_until_ready(
        attention_block(x, params, num_heads=H, q_tile=8, kv_tile=8,
                        compute_dtype=jnp.bfloat16))
    assert out_bf16.shape == (B, S, D)
    assert jnp.allclose(out_bf16, ref, atol=5e-2, rtol=5e-2), "bf16 path mismatch vs reference"

    print("KERNEL_OK")
</pallas_src>

<mosaic_0001>
module attributes {stable_mosaic.version = 11 : i64} {
  func.func @_attn_block_kernel(%arg0: i32, %arg1: i32, %arg2: i32, %arg3: memref<1x8x32xf32, #tpu.memory_space<vmem>>, %arg4: memref<1x4x8x8xf32, #tpu.memory_space<vmem>>, %arg5: memref<1x4x8x8xf32, #tpu.memory_space<vmem>>, %arg6: memref<1x4x8x8xf32, #tpu.memory_space<vmem>>, %arg7: memref<32x32xf32, #tpu.memory_space<vmem>>, %arg8: memref<1x32xf32, #tpu.memory_space<vmem>>, %arg9: memref<1x32xf32, #tpu.memory_space<vmem>>, %arg10: memref<1x32xf32, #tpu.memory_space<vmem>>, %arg11: memref<1x8x32xf32, #tpu.memory_space<vmem>>, %arg12: memref<4x8x1xf32, #tpu.memory_space<vmem>>, %arg13: memref<4x8x1xf32, #tpu.memory_space<vmem>>, %arg14: memref<4x8x8xf32, #tpu.memory_space<vmem>>) attributes {dimension_semantics = [#tpu.dimension_semantics<parallel>, #tpu.dimension_semantics<parallel>, #tpu.dimension_semantics<arbitrary>], iteration_bounds = array<i64: 2, 2, 2>, scalar_prefetch = 0 : i64, scratch_operands = 3 : i64, tpu.core_type = #tpu.core_type<tc>, window_params = [{transform_indices = @transform_0, window_bounds = array<i64: 1, 8, 32>}, {transform_indices = @transform_1, window_bounds = array<i64: 1, 4, 8, 8>}, {transform_indices = @transform_2, window_bounds = array<i64: 1, 4, 8, 8>}, {transform_indices = @transform_3, window_bounds = array<i64: 1, 4, 8, 8>}, {pipeline_mode = #tpu.pipeline_mode<synchronous>, transform_indices = @transform_4, window_bounds = array<i64: 32, 32>}, {pipeline_mode = #tpu.pipeline_mode<synchronous>, transform_indices = @transform_5, window_bounds = array<i64: 1, 32>}, {pipeline_mode = #tpu.pipeline_mode<synchronous>, transform_indices = @transform_6, window_bounds = array<i64: 1, 32>}, {pipeline_mode = #tpu.pipeline_mode<synchronous>, transform_indices = @transform_7, window_bounds = array<i64: 1, 32>}, {transform_indices = @transform_8, window_bounds = array<i64: 1, 8, 32>}]} {
    %c0_i32 = arith.constant 0 : i32
    %0 = arith.cmpi eq, %arg2, %c0_i32 : i32
    %1 = arith.extui %0 : i1 to i32
    %c0_i32_0 = arith.constant 0 : i32
    %2 = arith.cmpi ne, %1, %c0_i32_0 : i32
    scf.if %2 {
      %cst_34 = arith.constant 0xFF800000 : f32
      %35 = vector.broadcast %cst_34 : f32 to vector<4x8x1xf32>
      %c0_35 = arith.constant 0 : index
      %c0_36 = arith.constant 0 : index
      %c0_37 = arith.constant 0 : index
      %36 = vector.load %arg12[%c0_35, %c0_36, %c0_37] : memref<4x8x1xf32, #tpu.memory_space<vmem>>, vector<4x8x1xf32>
      tpu.vector_store %arg12[%c0_35, %c0_36, %c0_37], %35 {strides = array<i32>} : memref<4x8x1xf32, #tpu.memory_space<vmem>>, vector<4x8x1xf32>,
      %cst_38 = arith.constant 0.000000e+00 : f32
      %37 = vector.broadcast %cst_38 : f32 to vector<4x8x1xf32>
      %c0_39 = arith.constant 0 : index
      %c0_40 = arith.constant 0 : index
      %c0_41 = arith.constant 0 : index
      %38 = vector.load %arg13[%c0_39, %c0_40, %c0_41] : memref<4x8x1xf32, #tpu.memory_space<vmem>>, vector<4x8x1xf32>
      tpu.vector_store %arg13[%c0_39, %c0_40, %c0_41], %37 {strides = array<i32>} : memref<4x8x1xf32, #tpu.memory_space<vmem>>, vector<4x8x1xf32>,
      %cst_42 = arith.constant 0.000000e+00 : f32
      %39 = vector.broadcast %cst_42 : f32 to vector<4x8x8xf32>
      %c0_43 = arith.constant 0 : index
      %c0_44 = arith.constant 0 : index
      %c0_45 = arith.constant 0 : index
      %40 = vector.load %arg14[%c0_43, %c0_44, %c0_45] : memref<4x8x8xf32, #tpu.memory_space<vmem>>, vector<4x8x8xf32>
      tpu.vector_store %arg14[%c0_43, %c0_44, %c0_45], %39 {strides = array<i32>} : memref<4x8x8xf32, #tpu.memory_space<vmem>>, vector<4x8x8xf32>,
    } else {
    }
    %c0 = arith.constant 0 : index
    %c0_1 = arith.constant 0 : index
    %c0_2 = arith.constant 0 : index
    %c0_3 = arith.constant 0 : index
    %3 = vector.load %arg4[%c0, %c0_1, %c0_2, %c0_3] : memref<1x4x8x8xf32, #tpu.memory_space<vmem>>, vector<1x4x8x8xf32>
    %4 = vector.shape_cast %3 : vector<1x4x8x8xf32> to vector<4x8x8xf32>
    %c0_4 = arith.constant 0 : index
    %c0_5 = arith.constant 0 : index
    %c0_6 = arith.constant 0 : index
    %c0_7 = arith.constant 0 : index
    %5 = vector.load %arg5[%c0_4, %c0_5, %c0_6, %c0_7] : memref<1x4x8x8xf32, #tpu.memory_space<vmem>>, vector<1x4x8x8xf32>
    %6 = vector.shape_cast %5 : vector<1x4x8x8xf32> to vector<4x8x8xf32>
    "tpu.trace_start"() <{level = 10 : i32, message = "hqd,hkd->hqk"}> : () -> ()
    %cst = arith.constant dense<0.000000e+00> : vector<4x8x8xf32>
    %7 = tpu.matmul %4, %6, %cst {dimension_numbers = #tpu.dot_dimension_numbers<[2], [2], [1], [1], [0, 0, 0, 1, 1, 1], [0], [0]>} : vector<4x8x8xf32>, vector<4x8x8xf32>, vector<4x8x8xf32> -> vector<4x8x8xf32>
    "tpu.trace_stop"() : () -> ()
    %c0_8 = arith.constant 0 : index
    %c0_9 = arith.constant 0 : index
    %c0_10 = arith.constant 0 : index
    %8 = vector.load %arg12[%c0_8, %c0_9, %c0_10] : memref<4x8x1xf32, #tpu.memory_space<vmem>>, vector<4x8x1xf32>
    %cst_11 = arith.constant dense<0xFF800000> : vector<4x8xf32>
    %9 = vector.multi_reduction <maximumf>, %7, %cst_11 [2] : vector<4x8x8xf32> to vector<4x8xf32>
    %10 = vector.shape_cast %9 : vector<4x8xf32> to vector<4x8x1xf32>
    %11 = arith.maximumf %8, %10 : vector<4x8x1xf32>
    %12 = arith.subf %8, %11 : vector<4x8x1xf32>
    %13 = math.exp %12 : vector<4x8x1xf32>
    %14 = vector.broadcast %11 : vector<4x8x1xf32> to vector<4x8x8xf32>
    %15 = arith.subf %7, %14 : vector<4x8x8xf32>
    %16 = math.exp %15 : vector<4x8x8xf32>
    %c0_12 = arith.constant 0 : index
    %c0_13 = arith.constant 0 : index
    %c0_14 = arith.constant 0 : index
    %17 = vector.load %arg13[%c0_12, %c0_13, %c0_14] : memref<4x8x1xf32, #tpu.memory_space<vmem>>, vector<4x8x1xf32>
    %18 = arith.mulf %13, %17 : vector<4x8x1xf32>
    %cst_15 = arith.constant dense<0.000000e+00> : vector<4x8xf32>
    %19 = vector.multi_reduction <add>, %16, %cst_15 [2] : vector<4x8x8xf32> to vector<4x8xf32>
    %20 = vector.shape_cast %19 : vector<4x8xf32> to vector<4x8x1xf32>
    %21 = arith.addf %18, %20 : vector<4x8x1xf32>
    %c0_16 = arith.constant 0 : index
    %c0_17 = arith.constant 0 : index
    %c0_18 = arith.constant 0 : index
    %22 = vector.load %arg13[%c0_16, %c0_17, %c0_18] : memref<4x8x1xf32, #tpu.memory_space<vmem>>, vector<4x8x1xf32>
    tpu.vector_store %arg13[%c0_16, %c0_17, %c0_18], %21 {strides = array<i32>} : memref<4x8x1xf32, #tpu.memory_space<vmem>>, vector<4x8x1xf32>,
    %c0_19 = arith.constant 0 : index
    %c0_20 = arith.constant 0 : index
    %c0_21 = arith.constant 0 : index
    %23 = vector.load %arg14[%c0_19, %c0_20, %c0_21] : memref<4x8x8xf32, #tpu.memory_space<vmem>>, vector<4x8x8xf32>
    %24 = vector.broadcast %13 : vector<4x8x1xf32> to vector<4x8x8xf32>
    %25 = arith.mulf %24, %23 : vector<4x8x8xf32>
    %c0_22 = arith.constant 0 : index
    %c0_23 = arith.constant 0 : index
    %c0_24 = arith.constant 0 : index
    %c0_25 = arith.constant 0 : index
    %26 = vector.load %arg6[%c0_22, %c0_23, %c0_24, %c0_25] : memref<1x4x8x8xf32, #tpu.memory_space<vmem>>, vector<1x4x8x8xf32>
    %27 = vector.shape_cast %26 : vector<1x4x8x8xf32> to vector<4x8x8xf32>
    "tpu.trace_start"() <{level = 10 : i32, message = "hqk,hkd->hqd"}> : () -> ()
    %cst_26 = arith.constant dense<0.000000e+00> : vector<4x8x8xf32>
    %28 = tpu.matmul %16, %27, %cst_26 {dimension_numbers = #tpu.dot_dimension_numbers<[2], [1], [1], [2], [0, 0, 0, 1, 1, 2], [0], [0]>} : vector<4x8x8xf32>, vector<4x8x8xf32>, vector<4x8x8xf32> -> vector<4x8x8xf32>
    "tpu.trace_stop"() : () -> ()
    %29 = arith.addf %25, %28 : vector<4x8x8xf32>
    %c0_27 = arith.constant 0 : index
    %c0_28 = arith.constant 0 : index
    %c0_29 = arith.constant 0 : index
    %30 = vector.load %arg14[%c0_27, %c0_28, %c0_29] : memref<4x8x8xf32, #tpu.memory_space<vmem>>, vector<4x8x8xf32>
    tpu.vector_store %arg14[%c0_27, %c0_28, %c0_29], %29 {strides = array<i32>} : memref<4x8x8xf32, #tpu.memory_space<vmem>>, vector<4x8x8xf32>,
    %c0_30 = arith.constant 0 : index
    %c0_31 = arith.constant 0 : index
    %c0_32 = arith.constant 0 : index
    %31 = vector.load %arg12[%c0_30, %c0_31, %c0_32] : memref<4x8x1xf32, #tpu.memory_space<vmem>>, vector<4x8x1xf32>
    tpu.vector_store %arg12[%c0_30, %c0_31, %c0_32], %11 {strides = array<i32>} : memref<4x8x1xf32, #tpu.memory_space<vmem>>, vector<4x8x1xf32>,
    %c1_i32 = arith.constant 1 : i32
    %32 = arith.cmpi eq, %arg2, %c1_i32 : i32
    %33 = arith.extui %32 : i1 to i32
    %c0_i32_33 = arith.constant 0 : i32
    %34 = arith.cmpi ne, %33, %c0_i32_33 : i32
    scf.if %34 {
      %c0_34 = arith.constant 0 : index
      %c0_35 = arith.constant 0 : index
      %c0_36 = arith.constant 0 : index
      %35 = vector.load %arg13[%c0_34, %c0_35, %c0_36] : memref<4x8x1xf32, #tpu.memory_space<vmem>>, vector<4x8x1xf32>
      %36 = tpu.reciprocal %35 {approx = true} : vector<4x8x1xf32> -> vector<4x8x1xf32>
      %c0_37 = arith.constant 0 : index
      %c0_38 = arith.constant 0 : index
      %c0_39 = arith.constant 0 : index
      %37 = vector.load %arg14[%c0_37, %c0_38, %c0_39] : memref<4x8x8xf32, #tpu.memory_space<vmem>>, vector<4x8x8xf32>
      %38 = vector.broadcast %36 : vector<4x8x1xf32> to vector<4x8x8xf32>
      %39 = arith.mulf %37, %38 : vector<4x8x8xf32>
      %40 = tpu.transpose %39, [1, 0, 2] : vector<4x8x8xf32> -> vector<8x4x8xf32>
      %41 = vector.shape_cast %40 : vector<8x4x8xf32> to vector<8x32xf32>
      %c0_40 = arith.constant 0 : index
      %c0_41 = arith.constant 0 : index
      %42 = vector.load %arg7[%c0_40, %c0_41] : memref<32x32xf32, #tpu.memory_space<vmem>>, vector<32x32xf32>
      %cst_42 = arith.constant dense<0.000000e+00> : vector<8x32xf32>
      %43 = tpu.matmul %41, %42, %cst_42 {dimension_numbers = #tpu.dot_dimension_numbers<[1], [0], [0], [1], [0, 0, 1, 1], [], []>} : vector<8x32xf32>, vector<32x32xf32>, vector<8x32xf32> -> vector<8x32xf32>
      %c0_43 = arith.constant 0 : index
      %c0_44 = arith.constant 0 : index
      %44 = vector.load %arg8[%c0_43, %c0_44] : memref<1x32xf32, #tpu.memory_space<vmem>>, vector<1x32xf32>
      %45 = vector.broadcast %44 : vector<1x32xf32> to vector<8x32xf32>
      %46 = arith.addf %43, %45 : vector<8x32xf32>
      %c0_45 = arith.constant 0 : index
      %c0_46 = arith.constant 0 : index
      %c0_47 = arith.constant 0 : index
      %47 = vector.load %arg3[%c0_45, %c0_46, %c0_47] : memref<1x8x32xf32, #tpu.memory_space<vmem>>, vector<1x8x32xf32>
      %48 = vector.shape_cast %47 : vector<1x8x32xf32> to vector<8x32xf32>
      %cst_48 = arith.constant 5.000000e-01 : f32
      %49 = vector.broadcast %cst_48 : f32 to vector<8x32xf32>
      %50 = arith.mulf %49, %46 : vector<8x32xf32>
      %cst_49 = arith.constant 0.707106769 : f32
      %51 = vector.broadcast %cst_49 : f32 to vector<8x32xf32>
      %52 = arith.mulf %46, %51 : vector<8x32xf32>
      %53 = math.absf %52 : vector<8x32xf32>
      %cst_50 = arith.constant 0.327591091 : f32
      %54 = vector.broadcast %cst_50 : f32 to vector<8x32xf32>
      %55 = arith.mulf %54, %53 : vector<8x32xf32>
      %cst_51 = arith.constant 1.000000e+00 : f32
      %56 = vector.broadcast %cst_51 : f32 to vector<8x32xf32>
      %57 = arith.addf %56, %55 : vector<8x32xf32>
      %cst_52 = arith.constant 1.000000e+00 : f32
      %58 = vector.broadcast %cst_52 : f32 to vector<8x32xf32>
      %59 = arith.divf %58, %57 : vector<8x32xf32>
      %cst_53 = arith.constant 1.06140542 : f32
      %60 = vector.broadcast %cst_53 : f32 to vector<8x32xf32>
      %61 = arith.mulf %60, %59 : vector<8x32xf32>
      %cst_54 = arith.constant -1.45315206 : f32
      %62 = vector.broadcast %cst_54 : f32 to vector<8x32xf32>
      %63 = arith.addf %61, %62 : vector<8x32xf32>
      %64 = arith.mulf %63, %59 : vector<8x32xf32>
      %cst_55 = arith.constant 1.42141378 : f32
      %65 = vector.broadcast %cst_55 : f32 to vector<8x32xf32>
      %66 = arith.addf %64, %65 : vector<8x32xf32>
      %67 = arith.mulf %66, %59 : vector<8x32xf32>
      %cst_56 = arith.constant -0.284496725 : f32
      %68 = vector.broadcast %cst_56 : f32 to vector<8x32xf32>
      %69 = arith.addf %67, %68 : vector<8x32xf32>
      %70 = arith.mulf %69, %59 : vector<8x32xf32>
      %cst_57 = arith.constant 0.254829586 : f32
      %71 = vector.broadcast %cst_57 : f32 to vector<8x32xf32>
      %72 = arith.addf %70, %71 : vector<8x32xf32>
      %73 = arith.mulf %72, %59 : vector<8x32xf32>
      %cst_58 = arith.constant 0.000000e+00 : f32
      %74 = vector.broadcast %cst_58 : f32 to vector<8x32xf32>
      %75 = arith.subf %74, %53 : vector<8x32xf32>
      %76 = arith.mulf %75, %53 : vector<8x32xf32>
      %77 = math.exp %76 : vector<8x32xf32>
      %78 = arith.mulf %73, %77 : vector<8x32xf32>
      %cst_59 = arith.constant 1.000000e+00 : f32
      %79 = vector.broadcast %cst_59 : f32 to vector<8x32xf32>
      %80 = arith.subf %79, %78 : vector<8x32xf32>
      %cst_60 = arith.constant 0.000000e+00 : f32
      %81 = vector.broadcast %cst_60 : f32 to vector<8x32xf32>
      %82 = arith.cmpf oge, %52, %81 : vector<8x32xf32>
      %cst_61 = arith.constant 0.000000e+00 : f32
      %83 = vector.broadcast %cst_61 : f32 to vector<8x32xf32>
      %84 = arith.subf %83, %80 : vector<8x32xf32>
      %85 = arith.select %82, %80, %84 : vector<8x32xi1>, vector<8x32xf32>
      %cst_62 = arith.constant 1.000000e+00 : f32
      %86 = vector.broadcast %cst_62 : f32 to vector<8x32xf32>
      %87 = arith.addf %86, %85 : vector<8x32xf32>
      %88 = arith.mulf %50, %87 : vector<8x32xf32>
      %89 = arith.addf %88, %48 : vector<8x32xf32>
      %cst_63 = arith.constant dense<0.000000e+00> : vector<8xf32>
      %90 = vector.multi_reduction <add>, %89, %cst_63 [1] : vector<8x32xf32> to vector<8xf32>
      %91 = vector.shape_cast %90 : vector<8xf32> to vector<8x1xf32>
      %cst_64 = arith.constant 3.200000e+01 : f32
      %92 = vector.broadcast %cst_64 : f32 to vector<8x1xf32>
      %93 = arith.divf %91, %92 : vector<8x1xf32>
      %94 = vector.broadcast %93 : vector<8x1xf32> to vector<8x32xf32>
      %95 = arith.subf %89, %94 : vector<8x32xf32>
      %96 = vector.broadcast %93 : vector<8x1xf32> to vector<8x32xf32>
      %97 = arith.subf %89, %96 : vector<8x32xf32>
      %98 = arith.mulf %95, %97 : vector<8x32xf32>
      %cst_65 = arith.constant dense<0.000000e+00> : vector<8xf32>
      %99 = vector.multi_reduction <add>, %98, %cst_65 [1] : vector<8x32xf32> to vector<8xf32>
      %100 = vector.shape_cast %99 : vector<8xf32> to vector<8x1xf32>
      %cst_66 = arith.constant 3.200000e+01 : f32
      %101 = vector.broadcast %cst_66 : f32 to vector<8x1xf32>
      %102 = arith.divf %100, %101 : vector<8x1xf32>
      %103 = vector.broadcast %93 : vector<8x1xf32> to vector<8x32xf32>
      %104 = arith.subf %89, %103 : vector<8x32xf32>
      %cst_67 = arith.constant 9.99999974E-6 : f32
      %105 = vector.broadcast %cst_67 : f32 to vector<8x1xf32>
      %106 = arith.addf %102, %105 : vector<8x1xf32>
      %107 = math.rsqrt %106 : vector<8x1xf32>
      %108 = vector.broadcast %107 : vector<8x1xf32> to vector<8x32xf32>
      %109 = arith.mulf %104, %108 : vector<8x32xf32>
      %c0_68 = arith.constant 0 : index
      %c0_69 = arith.constant 0 : index
      %110 = vector.load %arg9[%c0_68, %c0_69] : memref<1x32xf32, #tpu.memory_space<vmem>>, vector<1x32xf32>
      %111 = vector.broadcast %110 : vector<1x32xf32> to vector<8x32xf32>
      %112 = arith.mulf %109, %111 : vector<8x32xf32>
      %c0_70 = arith.constant 0 : index
      %c0_71 = arith.constant 0 : index
      %113 = vector.load %arg10[%c0_70, %c0_71] : memref<1x32xf32, #tpu.memory_space<vmem>>, vector<1x32xf32>
      %114 = vector.broadcast %113 : vector<1x32xf32> to vector<8x32xf32>
      %115 = arith.addf %112, %114 : vector<8x32xf32>
      %c0_72 = arith.constant 0 : index
      %c0_73 = arith.constant 0 : index
      %c0_74 = arith.constant 0 : index
      %116 = vector.load %arg11[%c0_72, %c0_73, %c0_74] : memref<1x8x32xf32, #tpu.memory_space<vmem>>, vector<1x8x32xf32>
      %117 = vector.shape_cast %116 : vector<1x8x32xf32> to vector<8x32xf32>
      %118 = vector.shape_cast %115 : vector<8x32xf32> to vector<1x8x32xf32>
      tpu.vector_store %arg11[%c0_72, %c0_73, %c0_74], %118 {strides = array<i32>} : memref<1x8x32xf32, #tpu.memory_space<vmem>>, vector<1x8x32xf32>,
    } else {
    }
    return
  }
  func.func @transform_0(%arg0: i32, %arg1: i32, %arg2: i32) -> (i32, i32, i32) {
    %c0_i32 = arith.constant 0 : i32
    %c0_i32_0 = arith.constant 0 : i32
    return %arg0, %arg1, %c0_i32 : i32, i32, i32
  }
  func.func @transform_1(%arg0: i32, %arg1: i32, %arg2: i32) -> (i32, i32, i32, i32) {
    %c0_i32 = arith.constant 0 : i32
    %c0_i32_0 = arith.constant 0 : i32
    %c0_i32_1 = arith.constant 0 : i32
    return %arg0, %c0_i32, %arg1, %c0_i32_0 : i32, i32, i32, i32
  }
  func.func @transform_2(%arg0: i32, %arg1: i32, %arg2: i32) -> (i32, i32, i32, i32) {
    %c0_i32 = arith.constant 0 : i32
    %c0_i32_0 = arith.constant 0 : i32
    %c0_i32_1 = arith.constant 0 : i32
    return %arg0, %c0_i32, %arg2, %c0_i32_0 : i32, i32, i32, i32
  }
  func.func @transform_3(%arg0: i32, %arg1: i32, %arg2: i32) -> (i32, i32, i32, i32) {
    %c0_i32 = arith.constant 0 : i32
    %c0_i32_0 = arith.constant 0 : i32
    %c0_i32_1 = arith.constant 0 : i32
    return %arg0, %c0_i32, %arg2, %c0_i32_0 : i32, i32, i32, i32
  }
  func.func @transform_4(%arg0: i32, %arg1: i32, %arg2: i32) -> (i32, i32) {
    %c0_i32 = arith.constant 0 : i32
    %c0_i32_0 = arith.constant 0 : i32
    %c0_i32_1 = arith.constant 0 : i32
    return %c0_i32, %c0_i32_0 : i32, i32
  }
  func.func @transform_5(%arg0: i32, %arg1: i32, %arg2: i32) -> (i32, i32) {
    %c0_i32 = arith.constant 0 : i32
    %c0_i32_0 = arith.constant 0 : i32
    %c0_i32_1 = arith.constant 0 : i32
    return %c0_i32, %c0_i32_0 : i32, i32
  }
  func.func @transform_6(%arg0: i32, %arg1: i32, %arg2: i32) -> (i32, i32) {
    %c0_i32 = arith.constant 0 : i32
    %c0_i32_0 = arith.constant 0 : i32
    %c0_i32_1 = arith.constant 0 : i32
    return %c0_i32, %c0_i32_0 : i32, i32
  }
  func.func @transform_7(%arg0: i32, %arg1: i32, %arg2: i32) -> (i32, i32) {
    %c0_i32 = arith.constant 0 : i32
    %c0_i32_0 = arith.constant 0 : i32
    %c0_i32_1 = arith.constant 0 : i32
    return %c0_i32, %c0_i32_0 : i32, i32
  }
  func.func @transform_8(%arg0: i32, %arg1: i32, %arg2: i32) -> (i32, i32, i32) {
    %c0_i32 = arith.constant 0 : i32
    %c0_i32_0 = arith.constant 0 : i32
    return %arg0, %arg1, %c0_i32 : i32, i32, i32
  }
}

</mosaic_0001>

<bundles_post_ra>
// kernel: tpu_custom_call.1
= control target key start
LH: loop header
LB: loop body
LE: loop exit
PB: predicated region body
PF: predicated region fallthrough
CT: control target
= control target key end

     0   :  { %s2603_s0 = inlined_call_operand.vmem [shape: f32[2,16,32], index: 0, kind: input, shape index: {}]   ;;  %s2604_s1 = inlined_call_operand.vmem [shape: f32[2,4,16,8], index: 1, kind: input, shape index: {}]   ;;  %s2605_s2 = inlined_call_operand.vmem [shape: f32[2,4,16,8], index: 2, kind: input, shape index: {}]   ;;  %s2606_s3 = inlined_call_operand.vmem [shape: f32[2,4,16,8], index: 3, kind: input, shape index: {}]   ;;  %s2607_s4 = inlined_call_operand.vmem [shape: f32[32,32], index: 4, kind: input, shape index: {}]   ;;  %s2608_s5 = inlined_call_operand.vmem [shape: f32[1,32], index: 5, kind: input, shape index: {}]   ;;  %s2609_s6 = inlined_call_operand.vmem [shape: f32[1,32], index: 6, kind: input, shape index: {}]   ;;  %s2610_s7 = inlined_call_operand.vmem [shape: f32[1,32], index: 7, kind: input, shape index: {}]   ;;  %s2611_s8 = inlined_call_operand.hbm [shape: f32[2,16,32], index: 8, kind: output, shape index: {}]  }
   0x1   :  { %2618 = sst [smem:[#allocation16_spill]] %s2604_s1 }
   0x2   :  { %2619 = sst [smem:[#allocation17_spill]] %s2605_s2 }
   0x3   :  { %2620 = sst [smem:[#allocation18_spill]] %s2606_s3 }
   0x4   :  { %2621 = sst [smem:[#allocation19_spill]] %s2608_s5 }
   0x5   :  { %2622 = sst [smem:[#allocation20_spill]] %s2609_s6 }
   0x6   :  { %2623 = sst [smem:[#allocation21_spill]] %s2610_s7 }
   0x7   :  { %2624 = sst [smem:[#allocation22_spill]] %s2611_s8 }
   0x8   :  { %13 = vsyncpa [#allocation9], 0 }
   0x9   :  { %15 = vsyncpa [#allocation9 + $0x1], 0  ;;  %s2266_s27 = smov 0   ;;  %s2268_s28 = smov 0  }
   0xa   :  { %s2270_s29 = smov 0   ;;  %s2272_s30 = smov 0  }
   0xb   :  { %s2274_s9 = smov 0   ;;  %s2276_s10 = smov 0  }
   0xc   :  { %s2278_s11 = smov 0   ;;  %s2280_s12 = smov 0  }
   0xd   :  { %s2282_s13 = smov 0   ;;  %s2284_s14 = smov 0  }
   0xe   :  { %s2286_s15 = smov 0   ;;  %s2288_s16 = smov 0  }
   0xf LB: > { %2625 = sst [smem:[#allocation11_spill]] %s2160_s27  ;;  %s1804_s17 = sadd.s32 4294967295, %s2204_s16   ;;  %s2204_s16 = sphi %s2288_s16, %s21_s16   ;;  %s2200_s15 = sphi %s2286_s15, %s2656_s15   ;;  %s2196_s14 = sphi %s2284_s14, %s2655_s14   ;;  %s2192_s13 = sphi %s2282_s13, %s2654_s13   ;;  %s2188_s12 = sphi %s2280_s12, %s2653_s12   ;;  %s2184_s11 = sphi %s2278_s11, %s2652_s11   ;;  %s2180_s10 = sphi %s2276_s10, %s2651_s10   ;;  %s2176_s9 = sphi %s2274_s9, %s2650_s9   ;;  %s2172_s30 = sphi %s2272_s30, %s2649_s30   ;;  %s2168_s29 = sphi %s2270_s29, %s2648_s29   ;;  %s2164_s28 = sphi %s2268_s28, %s2647_s28   ;;  %s2160_s27 = sphi %s2266_s27, %s2646_s27  }
  0x10   : > { %s1805_s18 = sadd.s32 4294967294, %s2204_s16   ;;  %s33_s19 = sadd.s32 1, %s2192_s13 }
  0x11   : > { %p34_p0 = scmp.ge.s32.totalorder %s33_s19, 2  ;;  %s36_s20 = sadd.s32 1, %s2196_s14 }
  0x12   : > { %s40_s21 = sadd.s32 1, %s2200_s15  ;;  %p84_p1 = scmp.ne.s32.totalorder %s2176_s9, %s2172_s30 }
  0x13   : > { %s2658_s19 = smov (%p34_p0, %s33_s19), 0  ;;  %s2660_s20 = smov (!%p34_p0, %s36_s20), %s2196_s14 }
  0x14   : > { %2626 = sst [smem:[#allocation12_spill]] %s2658_s19  ;;  %s77_s22 = sadd.s32 1, %s2176_s9 }
  0x15   : > { %p85_p2 = scmp.eq.s32.totalorder %s2204_s16, 0  ;;  %p38_p3 = scmp.ge.s32.totalorder %s2660_s20, 2 }
  0x16   : > { %s101_s23 = ssub.s32 %s2192_s13, %s2658_s19  ;;  %p112_p5 = scmp.ne.s32.totalorder %s2168_s29, %s2164_s28 }
  0x17   : > { %p2343_p4 = por %p85_p2, %p84_p1  ;;  %s2662_s20 = smov (%p38_p3, %s2660_s20), 0 }
  0x18   : > { %2628 = sst [smem:[#allocation13_spill]] %s2662_s20  ;;  %s2664_s21 = smov (!%p38_p3, %s40_s21), %s2200_s15 }
  0x19   : > { %s73_s25 = ssub.s32 %s2196_s14, %s2662_s20  ;;  %p2354_p6 = por %p112_p5, %p85_p2 }
  0x1a   : > { %p42_p7 = scmp.ge.s32.totalorder %s2664_s21, 2  ;;  %p256_p8 = scmp.eq.s32.totalorder %s1804_s17, 7 }
  0x1b   : > { %p261_p9 = scmp.ne.s32.totalorder %s2172_s30, %s2160_s27  ;;  %p262_p10 = scmp.eq.s32.totalorder %s1805_s18, 7 }
  0x1c   : > { %s2666_s21 = smov (%p42_p7, %s2664_s21), 0  ;;  %p2365_p11 = por %p256_p8, %p84_p1 }
  0x1d   : > { %2630 = sst [smem:[#allocation14_spill]] %s2666_s21  ;;  %p2369_p12 = por %p262_p10, %p261_p9 }
  0x1e   : > { %s72_s20 = ssub.s32 %s2200_s15, %s2666_s21  ;;  %s105_s7 = sadd.s32 1, %s2168_s29 }
  0x1f   : > { %s2632_s8 = scalar_select %p2369_p12, 1, 0 }
  0x20   : > { %s74_s6 = sor.u32 %s73_s25, %s72_s20  ;;  %s102_s5 = sor.u32 %s101_s23, %s72_s20 }
  0x21   : > { %2633 = sst [smem:[#allocation15_spill]] %s2632_s8  ;;  %p75_p13 = scmp.eq.s32.totalorder %s74_s6, 0 }
  0x22   : > { %p103_p0 = scmp.eq.s32.totalorder %s102_s5, 0  ;;  %p1807_p2 = scmp.ge.s32.totalorder %s2204_s16, 8 }
  0x23   : > { %s2377_s17 = scalar_select %p75_p13, %s2176_s9, %s77_s22  }
  0x24   : > { %s2380_s18 = scalar_select %p103_p0, %s2168_s29, %s105_s7  }
  0x25   : > { %290 = sbr.rel (%p1807_p2) target bundleno = 80 (0x50), region = 32 }
  0x2c   : > { %304 = sbr.rel (!%p2343_p4) target bundleno = 56 (0x38), region = 40  ;;  %s306_s8 = sand.u32 (%p2343_p4), 1, %s2176_s9  }
  0x2d   : > { %s1809_s21 = sshll.u32 (%p2343_p4), %s2200_s15, 3  ;;  %s1808_s27 = sshll.u32 (%p2343_p4), %s306_s8, 5 }
  0x2e   : > { %s310_s25 = sadd.s32 (%p2343_p4), %s2196_s14, %s1809_s21  ;;  %s2634_s1 = sld [smem:[#allocation16_spill]] (%p2343_p4) }
  0x2f   : > { %s1810_s20 = sshll.u32 (%p2343_p4), %s310_s25, 3  ;;  %s308_s7 = scalar_lea.vmem (%p2343_p4), [#allocation5], %s1808_s27 }
  0x34   : > { %s312_s22 = scalar_lea.vmem %s2634_s1, %s1810_s20 }
  0x35   : > { %v346_v0 = vld [vmem:[%s312_s22] sm:$0xff]  ;;  %v348_v1 = vld [vmem:[%s312_s22 + $0x10] sm:$0xff] }
  0x36   : > { %v350_v2 = vld [vmem:[%s312_s22 + $0x20] sm:$0xff]  ;;  %347 = vst [vmem:[%s308_s7] sm:$0xff] %v346_v0  ;;  %349 = vst [vmem:[%s308_s7 + $0x8] sm:$0xff] %v348_v1  ;;  %v352_v3 = vld [vmem:[%s312_s22 + $0x30] sm:$0xff] }
  0x37   : > { %351 = vst [vmem:[%s308_s7 + $0x10] sm:$0xff] %v350_v2  ;;  %353 = vst [vmem:[%s308_s7 + $0x18] sm:$0xff] %v352_v3 }
  0x38 PF: > { %359 = sbr.rel (!%p2354_p6) target bundleno = 68 (0x44), region = 78  ;;  %s361_s8 = sand.u32 (%p2354_p6), 1, %s2168_s29  }
  0x39   : > { %s1812_s21 = sshll.u32 (%p2354_p6), %s2200_s15, 3  ;;  %s1811_s23 = sshll.u32 (%p2354_p6), %s361_s8, 5 }
  0x3a   : > { %s365_s24 = sadd.s32 (%p2354_p6), %s2192_s13, %s1812_s21  ;;  %s2635_s2 = sld [smem:[#allocation17_spill]] (%p2354_p6) }
  0x3b   : > { %s1813_s25 = sshll.u32 (%p2354_p6), %s365_s24, 3  ;;  %s363_s5 = scalar_lea.vmem (%p2354_p6), [#allocation6], %s1811_s23 }
  0x40   : > { %s367_s27 = scalar_lea.vmem %s2635_s2, %s1813_s25 }
  0x41   : > { %v401_v4 = vld [vmem:[%s367_s27] sm:$0xff]  ;;  %v403_v5 = vld [vmem:[%s367_s27 + $0x10] sm:$0xff] }
  0x42   : > { %v405_v6 = vld [vmem:[%s367_s27 + $0x20] sm:$0xff]  ;;  %402 = vst [vmem:[%s363_s5] sm:$0xff] %v401_v4  ;;  %404 = vst [vmem:[%s363_s5 + $0x8] sm:$0xff] %v403_v5  ;;  %v407_v7 = vld [vmem:[%s367_s27 + $0x30] sm:$0xff] }
  0x43   : > { %406 = vst [vmem:[%s363_s5 + $0x10] sm:$0xff] %v405_v6  ;;  %408 = vst [vmem:[%s363_s5 + $0x18] sm:$0xff] %v407_v7 }
  0x44 PF: > { %414 = sbr.rel (!%p2354_p6) target bundleno = 80 (0x50), region = 116  ;;  %s416_s22 = sand.u32 (%p2354_p6), 1, %s2168_s29  }
  0x45   : > { %s1815_s7 = sshll.u32 (%p2354_p6), %s2200_s15, 3  ;;  %s1814_s8 = sshll.u32 (%p2354_p6), %s416_s22, 5 }
  0x46   : > { %s420_s21 = sadd.s32 (%p2354_p6), %s2192_s13, %s1815_s7  ;;  %s2636_s3 = sld [smem:[#allocation18_spill]] (%p2354_p6) }
  0x47   : > { %s1816_s24 = sshll.u32 (%p2354_p6), %s420_s21, 3  ;;  %s418_s6 = scalar_lea.vmem (%p2354_p6), [#allocation7], %s1814_s8 }
  0x4c   : > { %s422_s23 = scalar_lea.vmem %s2636_s3, %s1816_s24 }
  0x4d   : > { %v456_v8 = vld [vmem:[%s422_s23] sm:$0xff]  ;;  %v458_v9 = vld [vmem:[%s422_s23 + $0x10] sm:$0xff] }
  0x4e   : > { %v460_v10 = vld [vmem:[%s422_s23 + $0x20] sm:$0xff]  ;;  %457 = vst [vmem:[%s418_s6] sm:$0xff] %v456_v8  ;;  %459 = vst [vmem:[%s418_s6 + $0x8] sm:$0xff] %v458_v9  ;;  %v462_v11 = vld [vmem:[%s422_s23 + $0x30] sm:$0xff] }
  0x4f   : > { %461 = vst [vmem:[%s418_s6 + $0x10] sm:$0xff] %v460_v10  ;;  %463 = vst [vmem:[%s418_s6 + $0x18] sm:$0xff] %v462_v11 }
  0x50 PF: > { %p1817_p1 = scmp.ge.s32.totalorder %s2204_s16, 1  ;;  %p468_p3 = scmp.lt.s32.totalorder %s2204_s16, 9 }
  0x52   : > { %p469_p4 = pnand %p1817_p1, %p468_p3 }
  0x53   : > { %s2410_s26 = sand.u32 (!%p469_p4), 1, %s2172_s30   ;;  %s482_s27 = sand.u32 (!%p469_p4), 1, %s2164_s28  }
  0x54   : > { %472 = sbr.rel (%p469_p4) target bundleno = 1698 (0x6a2), region = 154  ;;  %s1818_s5 = sshll.u32 (!%p469_p4), %s2410_s26, 5 }
  0x55   : > { %s1819_s22 = sshll.u32 (!%p469_p4), %s482_s27, 5  ;;  %s1821_s7 = sshll.u32 (!%p469_p4), %s2410_s26, 3 }
  0x56   : > { %p538_p5 = scmp.lt.s32.totalorder (!%p469_p4), %s2188_s12, 1  ;;  %p540_p6 = scmp.lt.s32.totalorder (!%p469_p4), %s2184_s11, 1 }
  0x57   : > { %s2424_s2 = scalar_lea.vmem (!%p469_p4), [#allocation5], %s1818_s5  ;;  %s2426_s3 = scalar_lea.vmem (!%p469_p4), [#allocation6], %s1819_s22 }
  0x58   : > { %s2428_s28 = scalar_lea.vmem (!%p469_p4), [#allocation7], %s1819_s22  ;;  %s2430_s27 = scalar_lea.vmem (!%p469_p4), [#allocation8], %s1821_s7 }
  0x59   : > { %p1824_p7 = scmp.ne.s32.totalorder (!%p469_p4), %s2180_s10, 0 }
  0x5b   : > { %s539_s8 = scalar_select %p538_p5, %s2188_s12, 1 }
  0x5c   : > { %s541_s21 = scalar_select %p540_p6, %s2184_s11, 1 }
  0x5d   : > { %s1822_s24 = sshll.u32 %s539_s8, 1  ;;  %549 = sbr.rel (%p1824_p7) target bundleno = 100 (0x64), region = 170  ;;  %vm550_vm0 = vcmask (!%p1824_p7), 7168   ;;  %vm559_vm1 = vcmask (!%p1824_p7), 64512   ;;  %v2206_v12 = vmov (!%p1824_p7), -inf   ;;  %v2207_v13 = vmov (!%p1824_p7), 0.0  }
  0x5e   : > { %s543_s25 = sadd.s32 %s1822_s24, %s541_s21  ;;  %551 = vst.msk [vmem:[#allocation2] sm:$0xff] (!%p1824_p7), %vm550_vm0, %v2206_v12  ;;  %552 = vst.msk [vmem:[#allocation2 + $0x8] sm:$0xff] (!%p1824_p7), %vm550_vm0, %v2206_v12 }
  0x5f   : > { %s1823_s20 = sshll.u32 %s543_s25, 3  ;;  %553 = vst.msk [vmem:[#allocation2 + $0x10] sm:$0xff] (!%p1824_p7), %vm550_vm0, %v2206_v12  ;;  %554 = vst.msk [vmem:[#allocation2 + $0x18] sm:$0xff] (!%p1824_p7), %vm550_vm0, %v2206_v12 }
  0x60   : > { %s2422_s1 = scalar_lea.vmem %s2603_s0, %s1823_s20  ;;  %555 = vst.msk [vmem:[#allocation3] sm:$0xff] (!%p1824_p7), %vm550_vm0, %v2207_v13  ;;  %556 = vst.msk [vmem:[#allocation3 + $0x8] sm:$0xff] (!%p1824_p7), %vm550_vm0, %v2207_v13 }
  0x61   : > { %557 = vst.msk [vmem:[#allocation3 + $0x10] sm:$0xff] (!%p1824_p7), %vm550_vm0, %v2207_v13  ;;  %558 = vst.msk [vmem:[#allocation3 + $0x18] sm:$0xff] (!%p1824_p7), %vm550_vm0, %v2207_v13 }
  0x62   : > { %560 = vst.msk [vmem:[#allocation4] sm:$0xff] (!%p1824_p7), %vm559_vm1, %v2207_v13  ;;  %561 = vst.msk [vmem:[#allocation4 + $0x8] sm:$0xff] (!%p1824_p7), %vm559_vm1, %v2207_v13 }
  0x63   : > { %562 = vst.msk [vmem:[#allocation4 + $0x10] sm:$0xff] (!%p1824_p7), %vm559_vm1, %v2207_v13  ;;  %563 = vst.msk [vmem:[#allocation4 + $0x18] sm:$0xff] (!%p1824_p7), %vm559_vm1, %v2207_v13 }
  0x64 PF: > { %v568_v14 = vld [vmem:[%s2426_s3] sm:$0xff]  ;;  %vm572_vm2 = vcmask 64512   ;;  %v569_v15 = vld [vmem:[%s2426_s3 + $0x8] sm:$0xff]  ;;  %v2208_v16 = vmov 0.0   ;;  %vm2209_vm3 = vmmov 0   ;;  %v570_v19 = vld [vmem:[%s2426_s3 + $0x10] sm:$0xff] }
  0x65   : > { %1870 = vmatprep.subr.mxu0 %v2208_v16  ;;  %1872 = vmatprep.mubr.msk.f32.mxu0 %vm2209_vm3, %v2208_v16  ;;  %v564_v17 = vld [vmem:[%s2424_s2] sm:$0xff]  ;;  %v565_v18 = vld [vmem:[%s2424_s2 + $0x8] sm:$0xff]  ;;  %v571_v20 = vld [vmem:[%s2426_s3 + $0x18] sm:$0xff]  ;;  %v2210_v35 = vmov 0   ;;  %vm965_vm4 = vcmask 7168   ;;  %p1837_p8 = scmp.ne.s32.totalorder %s2180_s10, 1 }
  0x66   : > { %1871 = vmatpush3.xpose.msk.msra.mxu0 %vm572_vm2, %v568_v14  ;;  %1875 = vmatprep.subr.mxu1 %v2208_v16  ;;  %v566_v21 = vld [vmem:[%s2424_s2 + $0x10] sm:$0xff]  ;;  %v567_v22 = vld [vmem:[%s2424_s2 + $0x18] sm:$0xff]  ;;  %v877_v36 = vld [vmem:[#allocation2] sm:$0xff]  ;;  %vm2215_vm5 = vmmov (!%p1837_p8), 0   ;;  %s2217_s24 = smov (!%p1837_p8), 16   ;;  %s2218_s25 = smov (!%p1837_p8), 8  }
  0x67   : > { %1876 = vmatpush3.xpose.msk.msra.mxu1 %vm572_vm2, %v569_v15  ;;  %1877 = vmatprep.mubr.msk.f32.mxu1 %vm2209_vm3, %v2208_v16  ;;  %v2471_v39 = vld [vmem:[#allocation2 + $0x8] sm:$0xff]  ;;  %v879_v40 = vld [vmem:[#allocation2 + $0x10] sm:$0xff]  ;;  %v2475_v47 = vld [vmem:[#allocation2 + $0x18] sm:$0xff]  ;;  %s2219_s20 = smov (!%p1837_p8), 24   ;;  %vm1495_vm6 = vcmask (!%p1837_p8), 130048   ;;  %vm1497_vm7 = vcmask (!%p1837_p8), 195584  }
  0x68   : > { %1880 = vmatprep.subr.mxu0 %v2208_v16  ;;  %1885 = vmatprep.subr.mxu1 %v2208_v16  ;;  %v998_v53 = vld [vmem:[%s2428_s28] sm:$0xff]  ;;  %v999_v55 = vld [vmem:[%s2428_s28 + $0x8] sm:$0xff]  ;;  %v1000_v3 = vld [vmem:[%s2428_s28 + $0x10] sm:$0xff]  ;;  %vm1510_vm8 = vcmask (!%p1837_p8), 261120   ;;  %s2638_s3 = sld [smem:[#allocation20_spill]] (!%p1837_p8)  ;;  %s2639_s22 = sld [smem:[#allocation21_spill]] (!%p1837_p8) }
  0x69   : > { %1873 = vmatmul.mubr.msk.f32.vlgmr.msra.gmra.mrb[0].mxu0 %vm572_vm2, %v564_v17  ;;  %2044 = vset.pattern.permute.xlu0 %v2210_v35  ;;  %v1001_v7 = vld [vmem:[%s2428_s28 + $0x18] sm:$0xff]  ;;  %s2637_s28 = sld [smem:[#allocation19_spill]] (!%p1837_p8) }
  0x6a   : > { %1878 = vmatmul.mubr.msk.f32.vlgmr.msra.gmra.mrb[0].mxu1 %vm572_vm2, %v565_v18  ;;  %1881 = vmatpush3.xpose.msk.msra.mxu0 %vm572_vm2, %v570_v19 }
  0x6b   : > { %1882 = vmatprep.mubr.msk.f32.mxu0 %vm2209_vm3, %v2208_v16  ;;  %1886 = vmatpush3.xpose.msk.msra.mxu1 %vm572_vm2, %v571_v20 }
  0x6c   : > { %1887 = vmatprep.mubr.msk.f32.mxu1 %vm2209_vm3, %v2208_v16  ;;  %1890 = vmatprep.subr.mxu0 %v2208_v16 }
  0x6d   : > { %1883 = vmatmul.mubr.msk.f32.vlgmr.msra.gmra.mrb[2].mxu0 %vm572_vm2, %v566_v21  ;;  %1895 = vmatprep.subr.mxu1 %v2208_v16  ;;  %v941_v21 = vld [vmem:[#allocation3] sm:$0xff] }
  0x6e   : > { %1888 = vmatmul.mubr.msk.f32.vlgmr.msra.gmra.mrb[2].mxu1 %vm572_vm2, %v567_v22  ;;  %1892 = vmatprep.mubr.msk.f32.mxu0 %vm2209_vm3, %v2208_v16 }
  0x6f   : > { %1897 = vmatprep.mubr.msk.f32.mxu1 %vm2209_vm3, %v2208_v16  ;;  %2045 = vset.pattern.permute.xlu1 %v2210_v35 }
  0x70   : > { %1891 = vmatpush3.msra.mxu0 %v998_v53  ;;  %1896 = vmatpush3.msra.mxu1 %v999_v55 }
  0x71   : > { %1900 = vmatprep.subr.mxu0 %v2208_v16  ;;  %1905 = vmatprep.subr.mxu1 %v2208_v16 }
 0x13c   : > { %v645_v23 = vpop.f32.mrb[0].mxu0 }
 0x13d   : > { %v1874_v24 = vpop.f32.mrb[1].mxu0  ;;  %v881_v25 = vsel %vm572_vm2, %v645_v23, -inf  ;;  %v721_v26 = vpop.f32.mrb[0].mxu1 }
 0x13e   : > { %882 = vmax.xlane.f32.xlu0 %v881_v25  ;;  %v1879_v27 = vpop.f32.mrb[1].mxu1  ;;  %v884_v28 = vsel %vm572_vm2, %v721_v26, -inf  ;;  %v942_v24 = vld [vmem:[#allocation3 + $0x8] sm:$0xff] }
 0x140   : > { %v797_v29 = vpop.f32.mrb[2].mxu0 }
 0x141   : > { %v1884_v30 = vpop.f32.mrb[3].mxu0  ;;  %v887_v31 = vsel %vm572_vm2, %v797_v29, -inf  ;;  %v873_v32 = vpop.f32.mrb[2].mxu1 }
 0x142   : > { %885 = vmax.xlane.f32.xlu0 %v884_v28  ;;  %888 = vmax.xlane.f32.xlu1 %v887_v31  ;;  %v1889_v33 = vpop.f32.mrb[3].mxu1  ;;  %v890_v34 = vsel %vm572_vm2, %v873_v32, -inf  ;;  %v943_v30 = vld [vmem:[#allocation3 + $0x10] sm:$0xff] }
 0x143   : > { %v944_v33 = vld [vmem:[#allocation3 + $0x18] sm:$0xff] }
 0x146   : > { %891 = vmax.xlane.f32.xlu1 %v890_v34 }
 0x1cb   : > { %v883_v37 = vpop.xlane.xlu0 %882 }
 0x1cc   : > { %v893_v38 = vmax.f32 %v877_v36, %v883_v37 }
 0x1ce   : > { %v897_v41 = vsub.f32 %v877_v36, %v893_v38  ;;  %1302 = vst.msk [vmem:[#allocation2] sm:$0xff] %vm965_vm4, %v893_v38  ;;  %911 = vperm.xlu0 %2044, %v893_v38   ;;  %v970_v38 = vld [vmem:[#allocation4] sm:$0xff] }
 0x1cf   : > { %v886_v42 = vpop.xlane.xlu0 %885  ;;  %v889_v43 = vpop.xlane.xlu1 %888 }
 0x1d0   : > { %v901_v44 = vmul.f32 1.442695, %v897_v41  ;;  %v894_v45 = vmax.f32 %v2471_v39, %v886_v42  ;;  %v895_v46 = vmax.f32 %v879_v40, %v889_v43 }
 0x1d2   : > { %2046 = vpow2.f32 %v901_v44  ;;  %v898_v48 = vsub.f32 %v2471_v39, %v894_v45  ;;  %1303 = vst.msk [vmem:[#allocation2 + $0x8] sm:$0xff] %vm965_vm4, %v894_v45  ;;  %916 = vperm.xlu1 %2045, %v894_v45   ;;  %v899_v49 = vsub.f32 %v879_v40, %v895_v46  ;;  %1304 = vst.msk [vmem:[#allocation2 + $0x10] sm:$0xff] %vm965_vm4, %v895_v46  ;;  %v971_v40 = vld [vmem:[#allocation4 + $0x8] sm:$0xff] }
 0x1d3   : > { %v892_v50 = vpop.xlane.xlu1 %891 }
 0x1d4   : > { %v896_v51 = vmax.f32 %v2475_v47, %v892_v50  ;;  %v905_v9 = vmul.f32 1.442695, %v899_v49  ;;  %v903_v13 = vmul.f32 1.442695, %v898_v48 }
 0x1d6   : > { %921 = vperm.xlu1 %2045, %v895_v46   ;;  %v900_v52 = vsub.f32 %v2475_v47, %v896_v51  ;;  %1305 = vst.msk [vmem:[#allocation2 + $0x18] sm:$0xff] %vm965_vm4, %v896_v51  ;;  %v972_v46 = vld [vmem:[#allocation4 + $0x10] sm:$0xff] }
 0x1da   : > { %926 = vperm.xlu1 %2045, %v896_v51   ;;  %v973_v51 = vld [vmem:[#allocation4 + $0x18] sm:$0xff] }
 0x1dc   : > { %v2047_v54 = vpop.eup %2046 }
 0x1dd   : > { %v945_v22 = vmul.f32 %v2047_v54, %v941_v21 }
 0x1de   : > { %976 = vperm.xlu1 %2045, %v2047_v54  }
 0x24d   : > { %v912_v56 = vpop.permute.xlu0 %911 }
 0x24e   : > { %v929_v57 = vsub.f32 %v645_v23, %v912_v56 }
 0x250   : > { %v933_v58 = vmul.f32 1.442695, %v929_v57 }
 0x251   : > { %v917_v59 = vpop.permute.xlu1 %916 }
 0x252   : > { %2048 = vpow2.f32 %v933_v58  ;;  %v930_v60 = vsub.f32 %v721_v26, %v917_v59 }
 0x254   : > { %v935_v61 = vmul.f32 1.442695, %v930_v60 }
 0x255   : > { %v922_v62 = vpop.permute.xlu1 %921 }
 0x256   : > { %2050 = vpow2.f32 %v935_v61  ;;  %v931_v63 = vsub.f32 %v797_v29, %v922_v62 }
 0x258   : > { %v937_v0 = vmul.f32 1.442695, %v931_v63  ;;  %v2211_v63 = vmov (!%p1837_p8), 0  }
 0x259   : > { %v927_v1 = vpop.permute.xlu1 %926 }
 0x25a   : > { %2052 = vpow2.f32 %v937_v0  ;;  %v932_v2 = vsub.f32 %v873_v32, %v927_v1 }
 0x25c   : > { %v2049_v4 = vpop.eup %2048  ;;  %v939_v5 = vmul.f32 1.442695, %v932_v2 }
 0x25d   : > { %1893 = vmatmul.mubr.msk.f32.vlgmr.msra.gmra.mrb[4].mxu0 %vm572_vm2, %v2049_v4  ;;  %v949_v6 = vsel %vm572_vm2, %v2049_v4, 0.0  ;;  %v977_v20 = vpop.permute.xlu1 %976 }
 0x25e   : > { %2054 = vpow2.f32 %v939_v5  ;;  %950 = vadd.xlane.f32.xlu1 %v949_v6  ;;  %1901 = vmatpush3.msra.mxu0 %v1000_v3  ;;  %v994_v39 = vmul.f32 %v977_v20, %v970_v38  ;;  %v1499_v5 = vld [vmem:[%s2607_s4] sm:$0xff] (!%p1837_p8)  ;;  %v1500_v6 = vld [vmem:[%s2607_s4 + $0x8] sm:$0xff] (!%p1837_p8) }
 0x25f   : > { %1902 = vmatprep.mubr.msk.f32.mxu0 %vm2209_vm3, %v2208_v16  ;;  %2056 = vpow2.f32 %v905_v9  ;;  %v2213_v9 = vmov (!%p1837_p8), 1983009808  }
 0x260   : > { %v2051_v8 = vpop.eup %2050  ;;  %2058 = vpow2.f32 %v903_v13 }
 0x261   : > { %1898 = vmatmul.mubr.msk.f32.vlgmr.msra.gmra.mrb[4].mxu1 %vm572_vm2, %v2051_v8  ;;  %v952_v10 = vsel %vm572_vm2, %v2051_v8, 0.0  ;;  %v1922_v8 = vpack.c.bf16 (!%p1837_p8), %v1500_v6, %v1499_v5 }
 0x262   : > { %953 = vadd.xlane.f32.xlu0 %v952_v10  ;;  %1906 = vmatpush3.msra.mxu1 %v1001_v7  ;;  %v2212_v7 = vmov (!%p1837_p8), 0.0|0.0   ;;  %v1349_v10 = vunpack.c.l.s4 (!%p1837_p8), %v2213_v9 }
 0x263   : > { %1907 = vmatprep.mubr.msk.f32.mxu1 %vm2209_vm3, %v2208_v16  ;;  %v907_v16 = vmul.f32 1.442695, %v900_v52  ;;  %1921 = vmatprep.subr.bf16.mxu0 (!%p1837_p8), %v2212_v7 }
 0x264   : > { %v2053_v11 = vpop.eup %2052 }
 0x265   : > { %1903 = vmatmul.mubr.msk.f32.vlgmr.msra.gmra.mrb[6].mxu0 %vm572_vm2, %v2053_v11  ;;  %v955_v17 = vsel %vm572_vm2, %v2053_v11, 0.0  ;;  %2060 = vpow2.f32 %v907_v16  ;;  %v1351_v11 = vlaneseq (!%p1837_p8) }
 0x266   : > { %1923 = vmatpush3.bf16.msra.mxu0 (!%p1837_p8), %v1922_v8 }
 0x267   : > { %1924 = vmatprep.subr.bf16.mxu0 (!%p1837_p8), %v2212_v7  ;;  %v1352_v20 = vshrl.u32 (!%p1837_p8), %v1351_v11, 7 }
 0x268   : > { %v2055_v12 = vpop.eup %2054 }
 0x269   : > { %1908 = vmatmul.mubr.msk.f32.vlgmr.msra.gmra.mrb[6].mxu1 %vm572_vm2, %v2055_v12  ;;  %v2057_v14 = vpop.eup %2056  ;;  %v958_v18 = vsel %vm572_vm2, %v2055_v12, 0.0 }
 0x26a   : > { %v2059_v15 = vpop.eup %2058  ;;  %v947_v31 = vmul.f32 %v2057_v14, %v943_v30 }
 0x26b   : > { %v946_v26 = vmul.f32 %v2059_v15, %v942_v24 }
 0x26f   : > { %986 = vperm.xlu1 %2045, %v2057_v14   ;;  %v2061_v19 = vpop.eup %2060 }
 0x270   : > { %v948_v35 = vmul.f32 %v2061_v19, %v944_v33 }
 0x278   : > { %981 = vperm.xlu0 %2044, %v2059_v15  }
 0x27c   : > { %2062 = vset.pattern.permute.xlu0 (!%p1837_p8), %v2211_v63 }
 0x293   : > { %956 = vadd.xlane.f32.xlu1 %v955_v17  ;;  %v2214_v17 = vmov (!%p1837_p8), 1934713408  }
 0x297   : > { %959 = vadd.xlane.f32.xlu1 %v958_v18  ;;  %v1381_v18 = vunpack.c.l.s4 (!%p1837_p8), %v2214_v17 }
 0x2a8   : > { %991 = vperm.xlu1 %2045, %v2061_v19   ;;  %v1350_v19 = vunpack.c.0.s8 (!%p1837_p8), %v1349_v10 }
 0x2ac   : > { %2063 = vset.pattern.permute.xlu1 (!%p1837_p8), %v2211_v63 }
 0x2eb   : > { %v951_v23 = vpop.xlane.xlu1 %950 }
 0x2ec   : > { %v961_v25 = vadd.f32 %v951_v23, %v945_v22 }
 0x2ee   : > { %966 = vst.msk [vmem:[#allocation3] sm:$0xff] %vm965_vm4, %v961_v25 }
 0x2ef   : > { %v954_v27 = vpop.xlane.xlu0 %953  ;;  %v987_v29 = vpop.permute.xlu1 %986 }
 0x2f0   : > { %v962_v28 = vadd.f32 %v954_v27, %v946_v26  ;;  %v996_v50 = vmul.f32 %v987_v29, %v972_v46  ;;  %v1382_v26 = vunpack.c.0.s8 (!%p1837_p8), %v1381_v18 }
 0x2f2   : > { %967 = vst.msk [vmem:[#allocation3 + $0x8] sm:$0xff] %vm965_vm4, %v962_v28  ;;  %v1353_v28 = vsub.s32 (!%p1837_p8), %v1350_v19, %v1352_v20 }
 0x2f5   : > { %v1310_v61 = vld [vmem:[#allocation3] sm:$0xff] (!%p1837_p8) }
 0x2f7   : > { %v982_v41 = vpop.permute.xlu0 %981 }
 0x2f8   : > { %v995_v45 = vmul.f32 %v982_v41, %v971_v40 }
 0x2f9   : > { %v1311_v0 = vld [vmem:[#allocation3 + $0x8] sm:$0xff] (!%p1837_p8) }
 0x320   : > { %v957_v32 = vpop.xlane.xlu1 %956 }
 0x321   : > { %v963_v34 = vadd.f32 %v957_v32, %v947_v31 }
 0x323   : > { %968 = vst.msk [vmem:[#allocation3 + $0x10] sm:$0xff] %vm965_vm4, %v963_v34  ;;  %v1385_v34 = vsub.s32 (!%p1837_p8), %v1382_v26, %v1352_v20 }
 0x324   : > { %v960_v36 = vpop.xlane.xlu1 %959 }
 0x325   : > { %v964_v37 = vadd.f32 %v960_v36, %v948_v35 }
 0x327   : > { %969 = vst.msk [vmem:[#allocation3 + $0x18] sm:$0xff] %vm965_vm4, %v964_v37 }
 0x328   : > { %v992_v52 = vpop.permute.xlu1 %991 }
 0x329   : > { %v997_v56 = vmul.f32 %v992_v52, %v973_v51 }
 0x32a   : > { %v1312_v60 = vld [vmem:[#allocation3 + $0x10] sm:$0xff] (!%p1837_p8) }
 0x32b   : > { %2064 = vrcp.f32 (!%p1837_p8), %v1312_v60 }
 0x32c   : > { %2066 = vrcp.f32 (!%p1837_p8), %v1310_v61 }
 0x32e   : > { %v1313_v62 = vld [vmem:[#allocation3 + $0x18] sm:$0xff] (!%p1837_p8) }
 0x32f   : > { %2068 = vrcp.f32 (!%p1837_p8), %v1313_v62 }
 0x330   : > { %v1071_v42 = vpop.f32.mrb[4].mxu0  ;;  %2070 = vrcp.f32 (!%p1837_p8), %v1311_v0 }
 0x331   : > { %v1294_v43 = vadd.f32 %v1071_v42, %v994_v39  ;;  %v1894_v44 = vpop.f32.mrb[5].mxu0 }
 0x332   : > { %v1502_v44 = vld [vmem:[%s2607_s4 + $0x18] sm:$0xff] (!%p1837_p8) }
 0x333   : > { %1298 = vst.msk [vmem:[#allocation4] sm:$0xff] %vm572_vm2, %v1294_v43  ;;  %v1501_v43 = vld [vmem:[%s2607_s4 + $0x10] sm:$0xff] (!%p1837_p8) }
 0x334   : > { %v1144_v47 = vpop.f32.mrb[4].mxu1 }
 0x335   : > { %v1295_v48 = vadd.f32 %v1144_v47, %v995_v45  ;;  %v1899_v49 = vpop.f32.mrb[5].mxu1  ;;  %v2065_v1 = vpop.eup (!%p1837_p8), %2064  ;;  %v1925_v45 = vpack.c.bf16 (!%p1837_p8), %v1502_v44, %v1501_v43 }
 0x336   : > { %v2067_v2 = vpop.eup (!%p1837_p8), %2066  ;;  %1334 = vperm.xlu1 (!%p1837_p8), %2063, %v2065_v1  }
 0x337   : > { %1299 = vst.msk [vmem:[#allocation4 + $0x8] sm:$0xff] %vm572_vm2, %v1295_v48  ;;  %1324 = vperm.xlu0 (!%p1837_p8), %2062, %v2067_v2   ;;  %1926 = vmatpush3.bf16.msra.mxu0 (!%p1837_p8), %v1925_v45 }
 0x338   : > { %v1217_v53 = vpop.f32.mrb[6].mxu0 }
 0x339   : > { %v1296_v54 = vadd.f32 %v1217_v53, %v996_v50  ;;  %v1904_v55 = vpop.f32.mrb[7].mxu0  ;;  %1309 = sbr.rel (%p1837_p8) target bundleno = 1673 (0x689), region = 174  ;;  %v2069_v3 = vpop.eup (!%p1837_p8), %2068 }
 0x33a   : > { %v2071_v4 = vpop.eup (!%p1837_p8), %2070  ;;  %1339 = vperm.xlu1 (!%p1837_p8), %2063, %v2069_v3   ;;  %v1318_v13 = vld [vmem:[#allocation4] sm:$0xff] (!%p1837_p8) }
 0x33b   : > { %1300 = vst.msk [vmem:[#allocation4 + $0x10] sm:$0xff] %vm572_vm2, %v1296_v54  ;;  %1329 = vperm.xlu0 (!%p1837_p8), %2062, %v2071_v4  }
 0x33c   : > { %v1290_v57 = vpop.f32.mrb[6].mxu1 }
 0x33d   : > { %v1297_v58 = vadd.f32 %v1290_v57, %v997_v56  ;;  %v1909_v59 = vpop.f32.mrb[7].mxu1 }
 0x33e   : > { %v1319_v23 = vld [vmem:[#allocation4 + $0x8] sm:$0xff] (!%p1837_p8) }
 0x33f   : > { %1301 = vst.msk [vmem:[#allocation4 + $0x18] sm:$0xff] %vm572_vm2, %v1297_v58  ;;  %v2216_v58 = vmov (!%p1837_p8), 0.0  }
 0x340   : > { %1918 = vmatprep.mubr.msk.f32.mxu0 %vm2215_vm5, %v2216_v58 }
 0x342   : > { %v1320_v12 = vld [vmem:[#allocation4 + $0x10] sm:$0xff] }
 0x346   : > { %v1321_v22 = vld [vmem:[#allocation4 + $0x18] sm:$0xff] }
 0x3b5   : > { %v1335_v14 = vpop.permute.xlu1 %1334 }
 0x3b6   : > { %v1325_v15 = vpop.permute.xlu0 %1324  ;;  %v1344_v16 = vmul.f32 %v1335_v14, %v1320_v12 }
 0x3b7   : > { %v1342_v21 = vmul.f32 %v1325_v15, %v1318_v13  ;;  %v1840_v13 = vld [vmem:[%s2637_s28] ss:$0 sm:$0xff] }
 0x3b9   : > { %v1340_v24 = vpop.permute.xlu1 %1339  ;;  %v1346_v29 = vcombine.low %v1342_v21, %v1344_v16  ;;  %v1347_v30 = vcombine.high %v1342_v21, %v1344_v16 }
 0x3ba   : > { %v1345_v25 = vmul.f32 %v1340_v24, %v1321_v22  ;;  %v1330_v27 = vpop.permute.xlu0 %1329 }
 0x3bb   : > { %v1343_v31 = vmul.f32 %v1330_v27, %v1319_v23  ;;  %v1354_v35 = vrot.slane %v1346_v29, %v1353_v28  ;;  %v1361_v36 = vrot.slane %v1347_v30, %v1353_v28 }
 0x3bd   : > { %v1362_v32 = vcombine.low %v1343_v31, %v1345_v25  ;;  %v1363_v33 = vcombine.high %v1343_v31, %v1345_v25 }
 0x3bf   : > { %v1370_v37 = vrot.slane %v1362_v32, %v1353_v28  ;;  %v1377_v38 = vrot.slane %v1363_v33, %v1353_v28 }
 0x3c1   : > { %v1378_v39 = vcombine.low %v1354_v35, %v1370_v37  ;;  %v1379_v40 = vcombine.high %v1354_v35, %v1370_v37  ;;  %v1394_v41 = vcombine.low %v1361_v36, %v1377_v38  ;;  %v1395_v42 = vcombine.high %v1361_v36, %v1377_v38 }
 0x3c3   : > { %v1386_v46 = vrot.slane %v1378_v39, %v1385_v34  ;;  %v1393_v47 = vrot.slane %v1379_v40, %v1385_v34  ;;  %v1402_v48 = vrot.slane %v1394_v41, %v1385_v34  ;;  %v1409_v49 = vrot.slane %v1395_v42, %v1385_v34  ;;  %v1584_v41 = vld [vmem:[%s2422_s1] sm:$0xff] }
 0x3c5   : > { %v1414_v50 = vcombine.low %v1386_v46, %v1393_v47  ;;  %v1838_v51 = vcombine.high %v1386_v46, %v1393_v47  ;;  %v1430_v52 = vcombine.low %v1402_v48, %v1409_v49  ;;  %v1839_v53 = vcombine.high %v1402_v48, %v1409_v49 }
 0x3c7   : > { %v1421_v54 = vrot.slane %v1414_v50, %v1353_v28  ;;  %v1429_v55 = vrot.slane %v1838_v51, %v1353_v28  ;;  %v1437_v56 = vrot.slane %v1430_v52, %v1353_v28  ;;  %v1445_v57 = vrot.slane %v1839_v53, %v1353_v28 }
 0x3c9   : > { %v1447_v59 = vcombine.high %v1421_v54, %v1429_v55  ;;  %v1463_v60 = vcombine.high %v1437_v56, %v1445_v57  ;;  %v1446_v61 = vcombine.low %v1421_v54, %v1429_v55  ;;  %v1462_v62 = vcombine.low %v1437_v56, %v1445_v57  ;;  %v1842_v54 = vld [vmem:[%s2638_s3] ss:$0 sm:$0xff] }
 0x3ca   : > { %v1843_v56 = vld [vmem:[%s2639_s22] ss:$0 sm:$0xff] }
 0x3cb   : > { %v1461_v63 = vrot.slane %v1447_v59, %v1385_v34  ;;  %v1477_v0 = vrot.slane %v1463_v60, %v1385_v34  ;;  %v1454_v1 = vrot.slane %v1446_v61, %v1385_v34  ;;  %v1470_v2 = vrot.slane %v1462_v62, %v1385_v34 }
 0x3cd   : > { %v1480_v3 = vcombine.low %v1461_v63, %v1477_v0  ;;  %v1479_v4 = vcombine.high %v1454_v1, %v1470_v2  ;;  %v1478_v5 = vcombine.low %v1454_v1, %v1470_v2  ;;  %v1481_v6 = vcombine.high %v1461_v63, %v1477_v0 }
 0x3cf   : > { %1487 = vrot.lane.b32.xlu1 %v1480_v3, %s2217_s24  ;;  %1483 = vrot.lane.b32.xlu0 %v1479_v4, %s2218_s25 }
 0x3d3   : > { %1491 = vrot.lane.b32.xlu0 %v1481_v6, %s2219_s20 }
 0x441   : > { %v1484_v7 = vpop.permute.xlu0 %1483  ;;  %v1488_v8 = vpop.permute.xlu1 %1487 }
 0x442   : > { %v1494_v9 = vsel %vm572_vm2, %v1478_v5, %v1484_v7 }
 0x443   : > { %v1496_v10 = vsel %vm1495_vm6, %v1494_v9, %v1488_v8 }
 0x445   : > { %v1492_v11 = vpop.permute.xlu0 %1491 }
 0x446   : > { %v1498_v12 = vsel %vm1497_vm7, %v1496_v10, %v1492_v11 }
 0x447   : > { %1919 = vmatmul.mubr.msk.f32.vlgmr.msra.gmra.mrb[0].mxu0 %vm1510_vm8, %v1498_v12 }
 0x51a   : > { %v1580_v14 = vpop.f32.mrb[0].mxu0 }
 0x51b   : > { %v1581_v15 = vadd.f32 %v1840_v13, %v1580_v14  ;;  %v1920_v17 = vpop.f32.mrb[1].mxu0 }
 0x51d   : > { %v1586_v18 = vmul.f32 0.70710677, %v1581_v15  ;;  %v1585_v39 = vmul.f32 0.5, %v1581_v15 }
 0x51f   : > { %v1587_v16 = vand.u32 2147483647, %v1586_v18  ;;  %vm1607_vm9 = vcmp.ge.f32.partialorder %v1586_v18, 0.0 }
 0x521   : > { %v1588_v19 = vmul.f32 0.3275911, %v1587_v16  ;;  %v1601_v21 = vsub.f32 0.0, %v1587_v16 }
 0x523   : > { %v1589_v20 = vadd.f32 1.0, %v1588_v19  ;;  %v1602_v23 = vmul.f32 %v1601_v21, %v1587_v16 }
 0x525   : > { %2072 = vrcp.f32 %v1589_v20  ;;  %v1603_v26 = vmul.f32 1.442695, %v1602_v23 }
 0x527   : > { %2074 = vpow2.f32 %v1603_v26 }
 0x52f   : > { %v2073_v22 = vpop.eup %2072 }
 0x530   : > { %v1592_v24 = vmul.f32 1.0614054, %v2073_v22 }
 0x531   : > { %v2075_v34 = vpop.eup %2074 }
 0x532   : > { %v1593_v25 = vadd.f32 -1.4531521, %v1592_v24 }
 0x534   : > { %v1594_v27 = vmul.f32 %v2073_v22, %v1593_v25 }
 0x536   : > { %v1595_v28 = vadd.f32 1.4214138, %v1594_v27 }
 0x538   : > { %v1596_v29 = vmul.f32 %v2073_v22, %v1595_v28 }
 0x53a   : > { %v1597_v30 = vadd.f32 -0.28449672, %v1596_v29 }
 0x53c   : > { %v1598_v31 = vmul.f32 %v2073_v22, %v1597_v30 }
 0x53e   : > { %v1599_v32 = vadd.f32 0.2548296, %v1598_v31 }
 0x540   : > { %v1600_v33 = vmul.f32 %v2073_v22, %v1599_v32 }
 0x542   : > { %v1605_v35 = vmul.f32 %v2075_v34, %v1600_v33 }
 0x544   : > { %v1606_v36 = vsub.f32 1.0, %v1605_v35 }
 0x546   : > { %v1608_v37 = vsub.f32 0.0, %v1606_v36 }
 0x548   : > { %v1609_v38 = vsel %vm1607_vm9, %v1606_v36, %v1608_v37 }
 0x549   : > { %v1610_v40 = vadd.f32 1.0, %v1609_v38 }
 0x54b   : > { %v1611_v42 = vmul.f32 %v1610_v40, %v1585_v39 }
 0x54d   : > { %v1612_v43 = vadd.f32 %v1611_v42, %v1584_v41 }
 0x54f   : > { %v1613_v44 = vsel %vm1510_vm8, %v1612_v43, 0.0 }
 0x550   : > { %1614 = vadd.xlane.f32.xlu1 %v1613_v44 }
 0x5dd   : > { %v1615_v45 = vpop.xlane.xlu1 %1614 }
 0x5de   : > { %v1617_v46 = vmul.f32 0.03125, %v1615_v45 }
 0x5e0   : > { %v1618_v47 = vsub.f32 %v1612_v43, %v1617_v46 }
 0x5e2   : > { %v1619_v48 = vmul.f32 %v1618_v47, %v1618_v47 }
 0x5e4   : > { %v1620_v49 = vsel %vm1510_vm8, %v1619_v48, 0.0 }
 0x5e5   : > { %1621 = vadd.xlane.f32.xlu0 %v1620_v49 }
 0x672   : > { %v1622_v50 = vpop.xlane.xlu0 %1621 }
 0x673   : > { %v1623_v51 = vmul.f32 0.03125, %v1622_v50 }
 0x675   : > { %v1624_v52 = vadd.f32 1e-05, %v1623_v51 }
 0x677   : > { %2076 = vrsqrt.f32 %v1624_v52 }
 0x681   : > { %v2077_v53 = vpop.eup %2076 }
 0x682   : > { %v1626_v55 = vmul.f32 %v2077_v53, %v1618_v47 }
 0x684   : > { %v1634_v57 = vmul.f32 %v1842_v54, %v1626_v55 }
 0x686   : > { %v1642_v58 = vadd.f32 %v1843_v56, %v1634_v57 }
 0x688   : > { %1643 = vst.msk [vmem:[%s2430_s27] sm:$0xff] %vm1510_vm8, %v1642_v58 }
 0x689 PF: > { %s1845_s7 = sshll.u32 %s2188_s12, 1  ;;  %s1660_s21 = sshll.u32 %s2430_s27, 4  ;;  %s2541_s21 = int_to_ptr.vmem [resolvable:$true] %s1660_s21 }
 0x68a   : > { %s1656_s8 = sadd.s32 %s2184_s11, %s1845_s7  ;;  %s2640_s23 = sld [smem:[#allocation22_spill]] }
 0x68b   : > { %s1846_s24 = sshll.u32 %s1656_s8, 7  ;;  %s1645_s28 = scalar_lea.sflag [#allocation9], %s2410_s26 }
 0x68c   : > { %s2078_s2 = scalar_lea.vmem %s2541_s21, 128  ;;  %s2220_s1 = smov [#allocation8]  }
 0x68d   : > { %p2079_p9 = scmp.ne.s32.totalorder %s2541_s21, %s2078_s2  ;;  %s2082_s12 = sshll.u32 %s2220_s1, 4  ;;  %s2083_s12 = int_to_ptr.vmem [resolvable:$false] %s2082_s12 }
 0x68e   : > { %s2084_s11 = scalar_lea.vmem %s2083_s12, 256  ;;  %p2085_p0 = scmp.lt.s32.totalorder %s2541_s21, %s2083_s12 }
 0x68f   : > { %p2080_p10 = pnand %p2079_p9, %p2365_p11  ;;  %p2086_p2 = scmp.lt.s32.totalorder %s2084_s11, %s2078_s2 }
 0x690   : > { %s1658_s6 = scalar_lea.hbm %s2640_s23, %s1846_s24 }
 0x691   : > { %p2081_p13 = pneg %p2080_p10  ;;  %p2087_p1 = por %p2086_p2, %p2085_p0 }
 0x693   : > { %p2088_p3 = pnand %p2087_p1, %p2081_p13 }
 0x695   : > { %2091 = shalt.err (!%p2088_p3)
}
 0x696   : > { %s2092_s27 = scalar_lea.hbm %s1658_s6, 128  ;;  %s2096_s10 = scalar_lea.hbm %s2640_s23, 512 }
 0x697   : > { %p2093_p4 = scmp.ne.s32.totalorder %s1658_s6, %s2092_s27  ;;  %p2097_p7 = scmp.lt.u32.totalorder %s1658_s6, %s2640_s23 }
 0x698   : > { %p2098_p8 = scmp.lt.u32.totalorder %s2096_s10, %s2092_s27  ;;  %p2100_p10 = scmp.lt.u32.totalorder %s2092_s27, %s1658_s6 }
 0x699   : > { %p2094_p5 = pnand %p2093_p4, %p2365_p11 }
 0x69a   : > { %p2099_p9 = por %p2098_p8, %p2097_p7 }
 0x69b   : > { %p2095_p6 = pneg %p2094_p5 }
 0x69c   : > { %p2101_p0 = por %p2100_p10, %p2099_p9 }
 0x69e   : > { %p2102_p13 = pnand %p2101_p0, %p2095_p6 }
 0x6a0   : > { %2105 = shalt.err (!%p2102_p13)
}
 0x6a1   : > { %1927 = dma.vmem_to_hbm [thread:$0]  (%p2365_p11), %s2541_s21, 128, %s1658_s6, %s1645_s28  }
 0x6a2 PF: > { %s2641_s7 = sld [smem:[#allocation11_spill]]  ;;  %p1933_p2 = scmp.ge.s32.totalorder %s2204_s16, 2 }
 0x6a4   : > { %p1930_p1 = pnand %p1933_p2, %p2369_p12 }
 0x6a8   : > { %s1672_s24 = sand.u32 1, %s2641_s7  }
 0x6a9   : > { %s1673_s25 = scalar_lea.sflag [#allocation9], %s1672_s24 }
 0x6aa   : > { %2155 = dma.done.wait (!%p1930_p1), %s1673_s25, 128  }
 0x6ab   : > { %2157 = vsyncadd (!%p1930_p1), %s1673_s25, 4294967168  ;;  %s21_s16 = sadd.s32 1, %s2204_s16   ;;  %s2643_s19 = sld [smem:[#allocation12_spill]] }
 0x6ac   : > { %p18_p3 = scmp.ge.s32.totalorder %s21_s16, 10   ;;  %s2644_s21 = sld [smem:[#allocation13_spill]] }
 0x6ad   : > { %s2645_s20 = sld [smem:[#allocation14_spill]]  ;;  %s2646_s27 = smov %s2172_s30 }
 0x6ae   : > { %s2647_s28 = smov %s2168_s29  ;;  %s2648_s29 = smov %s2380_s18 }
 0x6af   : > { %s2649_s30 = smov %s2176_s9  ;;  %s2650_s9 = smov %s2377_s17 }
 0x6b0   : > { %s2651_s10 = smov %s2192_s13  ;;  %s2652_s11 = smov %s2196_s14 }
 0x6b1   : > { %s2653_s12 = smov %s2200_s15  ;;  %s2654_s13 = smov %s2643_s19 }
 0x6b2   : > { %s2655_s14 = smov %s2644_s21  ;;  %20 = sbr.rel (!%p18_p3) target bundleno = 15 (0xf), region = 233 }
 0x6b3   : > { %s2656_s15 = smov %s2645_s20 }
 0x6b9   :  { %1678 = vsyncpa [#allocation9], 1 }
 0x6ba   :  { %1680 = vsyncpa [#allocation9 + $0x1], 1 }

</bundles_post_ra>
